<compile_context>
chip_gen: v7x
topology: tpu7x:2x2x1
jax: 0.10.0
libtpu: 0.0.40
codegen_flags: <defaults>
</compile_context>

<pallas_src>
import jax
import jax.numpy as jnp
from jax.experimental import pallas as pl
from jax.experimental.pallas import tpu as pltpu

BN_EPS = 1e-5
_INV_SQRT2 = 0.7071067811865476


def _erf_approx(x):
    # Abramowitz & Stegun 7.1.26 (max abs err ~1.5e-7); exp -> EUP, rest -> VPU.
    p = 0.3275911
    a1, a2, a3, a4, a5 = (0.254829592, -0.284496736, 1.421413741,
                          -1.453152027, 1.061405429)
    ax = jnp.abs(x)
    t = 1.0 / (1.0 + p * ax)
    poly = ((((a5 * t + a4) * t + a3) * t + a2) * t + a1) * t
    y = 1.0 - poly * jnp.exp(-(ax * ax))
    return jnp.where(x < 0, -y, y)


def _gelu_kernel(x):
    # matches torch.nn.GELU() (exact, erf-based) to ~1e-7
    return 0.5 * x * (1.0 + _erf_approx(x * _INV_SQRT2))


def _gelu_exact(x):
    return 0.5 * x * (1.0 + jax.lax.erf(x * _INV_SQRT2))


def _choose_nb(n, c, out_dim, hw, act_budget_bytes=12 * 2**20):
    """Images per grid step: amortize step overhead, keep >=2 steps for v7x."""
    # per-item bytes: double-buffered x/out blocks + live f32 temps (tap, z, h, y)
    per_item = 4 * hw * (2 * (c + out_dim) + 2 * c + 4 * c + out_dim)
    cap = max(1, act_budget_bytes // max(per_item, 1))
    if n >= 2:
        return int(max(1, min(cap, n // 2)))
    return 1


def irmlp_forward(x_nchw, w1, w2, w3, bn1, bn3):
    """x_nchw: (N, C, H, W) f32.  w1: (C, C, 3, 3) OIHW, w2: (4C, C),
    w3: (out, 4C).  bn1/bn3: (gamma, beta, running_mean, running_var).
    Returns (N, out_dim, H, W)."""
    N, C, H, W = x_nchw.shape
    out_dim = w3.shape[0]
    HW = H * W

    # ---- trace-time parameter folding (inference-mode BN -> 1x1 weights) ----
    g1, bb1, m1, v1 = bn1
    g3, bb3, m3, v3 = bn3
    s1 = g1 * jax.lax.rsqrt(v1 + BN_EPS)
    t1 = bb1 - m1 * s1
    s3 = g3 * jax.lax.rsqrt(v3 + BN_EPS)
    t3 = bb3 - m3 * s3

    w1tap = jnp.transpose(w1, (2, 3, 0, 1)).reshape(9, C, C)   # [dy*3+dx, o, i]
    w2f = w2 * s1[None, :]                                     # (4C, C)
    b2f = (w2 @ t1).reshape(4 * C, 1)                          # (4C, 1)
    w3f = w3 * s3[:, None]                                     # (out, 4C)
    b3f = t3.reshape(out_dim, 1)                               # (out, 1)

    # ---- batch grouping: NB images per grid step, lane axis = NB*H*W ----
    NB = _choose_nb(N, C, out_dim, HW)
    G = -(-N // NB)
    Npad = G * NB
    L = NB * HW

    x_flat = x_nchw.reshape(N, C, HW)
    if Npad != N:
        x_flat = jnp.pad(x_flat, ((0, Npad - N), (0, 0), (0, 0)))
    x_g = x_flat.reshape(G, NB, C, HW).transpose(0, 2, 1, 3).reshape(G, C, L)

    # per-lane (y, x) coordinates of the (nb, y, x)-ordered lane axis; used to
    # zero the 'SAME'-padding taps after each roll.
    yc = jnp.tile(jnp.repeat(jnp.arange(H, dtype=jnp.int32), W), NB).reshape(1, L)
    xc = jnp.tile(jnp.arange(W, dtype=jnp.int32), NB * H).reshape(1, L)

    def kernel(x_ref, yc_ref, xc_ref, w1_ref, w2_ref, b2_ref, w3_ref, b3_ref,
               o_ref):
        xs = x_ref[...]                  # (C, L): conv1 input == residual
        ycv = yc_ref[...]                # (1, L) int32
        xcv = xc_ref[...]                # (1, L) int32

        # 3x3 'SAME' conv: 9 accumulating (C,C)x(C,L) matmuls on shifted views.
        acc = None
        for dy in range(3):
            for dx in range(3):
                oy, ox = dy - 1, dx - 1
                v = xs
                if oy != 0 or ox != 0:
                    off = oy * W + ox
                    v = pltpu.roll(v, (-off) % L, axis=1)
                    valid = None
                    if oy == -1:
                        valid = ycv > 0
                    elif oy == 1:
                        valid = ycv < H - 1
                    if ox == -1:
                        m = xcv > 0
                        valid = m if valid is None else jnp.logical_and(valid, m)
                    elif ox == 1:
                        m = xcv < W - 1
                        valid = m if valid is None else jnp.logical_and(valid, m)
                    v = jnp.where(valid, v, 0.0)
                part = jnp.dot(w1_ref[dy * 3 + dx], v,
                               preferred_element_type=jnp.float32)
                acc = part if acc is None else acc + part

        z = _gelu_kernel(acc) + xs        # bn1 folded into w2f/b2f
        h = _gelu_kernel(jnp.dot(w2_ref[...], z,
                                 preferred_element_type=jnp.float32)
                         + b2_ref[...])
        y = jnp.dot(w3_ref[...], h,
                    preferred_element_type=jnp.float32) + b3_ref[...]
        o_ref[...] = y.astype(o_ref.dtype)

    # Explicit VMEM budget: double-buffered activation blocks + weights + temps.
    est = 4 * (2 * L * (C + out_dim)
               + 4 * L
               + 2 * (9 * C * C + 4 * C * C + out_dim * 4 * C + 4 * C + out_dim)
               + L * (2 * C + 4 * C + out_dim))
    vmem_limit = int(min(max(4 * est, 16 * 2**20), 48 * 2**20))

    y = pl.pallas_call(
        kernel,
        out_shape=jax.ShapeDtypeStruct((G, out_dim, L), x_nchw.dtype),
        grid=(G,),
        in_specs=[
            pl.BlockSpec((None, C, L), lambda g: (g, 0, 0)),      # x slab
            pl.BlockSpec((1, L), lambda g: (0, 0)),               # y coords
            pl.BlockSpec((1, L), lambda g: (0, 0)),               # x coords
            # TODO(synk): at large C, avoid double-buffering the constant
            # weight blocks (pipeline_mode=pl.Buffered(1) or manual copy into
            # scratch) against v7x's 64 MiB VMEM.
            pl.BlockSpec((9, C, C), lambda g: (0, 0, 0)),          # conv1 taps
            pl.BlockSpec((4 * C, C), lambda g: (0, 0)),            # w2 (bn1 folded)
            pl.BlockSpec((4 * C, 1), lambda g: (0, 0)),            # b2
            pl.BlockSpec((out_dim, 4 * C), lambda g: (0, 0)),      # w3 (bn3 folded)
            pl.BlockSpec((out_dim, 1), lambda g: (0, 0)),          # b3
        ],
        out_specs=pl.BlockSpec((None, out_dim, L), lambda g: (g, 0, 0)),
        compiler_params=pltpu.CompilerParams(
            dimension_semantics=("parallel",),
            vmem_limit_bytes=vmem_limit),
    )(x_g, yc, xc, w1tap, w2f, b2f, w3f, b3f)

    y = y.reshape(G, out_dim, NB, HW).transpose(0, 2, 1, 3)
    return y.reshape(Npad, out_dim, H, W)[:N]


def ref_forward(x, w1, w2, w3, bn1, bn3):
    """Pure-JAX reference of the PyTorch IRMLP forward (NCHW, eval-mode BN)."""
    hi = jax.lax.Precision.HIGHEST
    dn = jax.lax.conv_dimension_numbers(x.shape, w1.shape,
                                        ('NCHW', 'OIHW', 'NCHW'))
    out = jax.lax.conv_general_dilated(x, w1, (1, 1), 'SAME',
                                       dimension_numbers=dn, precision=hi)
    out = _gelu_exact(out)
    out = out + x
    g1, b1, m1, v1 = bn1
    out = ((out - m1[None, :, None, None])
           * (g1 * jax.lax.rsqrt(v1 + BN_EPS))[None, :, None, None]
           + b1[None, :, None, None])
    h = _gelu_exact(jnp.einsum('nchw,dc->ndhw', out, w2, precision=hi))
    y = jnp.einsum('nchw,dc->ndhw', h, w3, precision=hi)
    g3, b3, m3, v3 = bn3
    y = ((y - m3[None, :, None, None])
         * (g3 * jax.lax.rsqrt(v3 + BN_EPS))[None, :, None, None]
         + b3[None, :, None, None])
    return y


if __name__ == "__main__":
    key = jax.random.PRNGKey(0)
    ks = jax.random.split(key, 12)

    N, C, H, W = 2, 4, 16, 16          # small shapes consistent with the module
    out_dim = 8

    x = jax.random.normal(ks[0], (N, C, H, W), jnp.float32)      # NCHW

    w1 = 0.2 * jax.random.normal(ks[1], (C, C, 3, 3), jnp.float32)      # conv1 OIHW
    w2 = 0.2 * jax.random.normal(ks[2], (4 * C, C), jnp.float32)        # conv2 1x1
    w3 = 0.2 * jax.random.normal(ks[3], (out_dim, 4 * C), jnp.float32)  # conv3 1x1

    bn1 = (1.0 + 0.1 * jax.random.normal(ks[4], (C,), jnp.float32),   # gamma
           0.05 * jax.random.normal(ks[5], (C,), jnp.float32),        # beta
           0.1 * jax.random.normal(ks[6], (C,), jnp.float32),         # running_mean
           0.5 + jax.random.uniform(ks[7], (C,), jnp.float32))        # running_var
    bn3 = (1.0 + 0.1 * jax.random.normal(ks[8], (out_dim,), jnp.float32),
           0.05 * jax.random.normal(ks[9], (out_dim,), jnp.float32),
           0.1 * jax.random.normal(ks[10], (out_dim,), jnp.float32),
           0.5 + jax.random.uniform(ks[11], (out_dim,), jnp.float32))

    y = jax.jit(irmlp_forward)(x, w1, w2, w3, bn1, bn3)
    jax.block_until_ready(y)

    y_ref = ref_forward(x, w1, w2, w3, bn1, bn3)
    max_err = float(jnp.max(jnp.abs(y - y_ref)))
    assert jnp.allclose(y, y_ref, atol=5e-4, rtol=5e-4), f"max_err={max_err}"

    print("KERNEL_OK")
</pallas_src>

<mosaic_0001>
module attributes {stable_mosaic.version = 11 : i64} {
  func.func @kernel(%arg0: i32, %arg1: memref<1x4x256xf32, #tpu.memory_space<vmem>>, %arg2: memref<1x256xi32, #tpu.memory_space<vmem>>, %arg3: memref<1x256xi32, #tpu.memory_space<vmem>>, %arg4: memref<9x4x4xf32, #tpu.memory_space<vmem>>, %arg5: memref<16x4xf32, #tpu.memory_space<vmem>>, %arg6: memref<16x1xf32, #tpu.memory_space<vmem>>, %arg7: memref<8x16xf32, #tpu.memory_space<vmem>>, %arg8: memref<8x1xf32, #tpu.memory_space<vmem>>, %arg9: memref<1x8x256xf32, #tpu.memory_space<vmem>>) attributes {dimension_semantics = [#tpu.dimension_semantics<parallel>], iteration_bounds = array<i64: 2>, scalar_prefetch = 0 : i64, scratch_operands = 0 : i64, tpu.core_type = #tpu.core_type<tc>, window_params = [{transform_indices = @transform_0, window_bounds = array<i64: 1, 4, 256>}, {pipeline_mode = #tpu.pipeline_mode<synchronous>, transform_indices = @transform_1, window_bounds = array<i64: 1, 256>}, {pipeline_mode = #tpu.pipeline_mode<synchronous>, transform_indices = @transform_2, window_bounds = array<i64: 1, 256>}, {pipeline_mode = #tpu.pipeline_mode<synchronous>, transform_indices = @transform_3, window_bounds = array<i64: 9, 4, 4>}, {pipeline_mode = #tpu.pipeline_mode<synchronous>, transform_indices = @transform_4, window_bounds = array<i64: 16, 4>}, {pipeline_mode = #tpu.pipeline_mode<synchronous>, transform_indices = @transform_5, window_bounds = array<i64: 16, 1>}, {pipeline_mode = #tpu.pipeline_mode<synchronous>, transform_indices = @transform_6, window_bounds = array<i64: 8, 16>}, {pipeline_mode = #tpu.pipeline_mode<synchronous>, transform_indices = @transform_7, window_bounds = array<i64: 8, 1>}, {transform_indices = @transform_8, window_bounds = array<i64: 1, 8, 256>}]} {
    %c0 = arith.constant 0 : index
    %c0_0 = arith.constant 0 : index
    %c0_1 = arith.constant 0 : index
    %0 = vector.load %arg1[%c0, %c0_0, %c0_1] : memref<1x4x256xf32, #tpu.memory_space<vmem>>, vector<1x4x256xf32>
    %1 = vector.shape_cast %0 : vector<1x4x256xf32> to vector<4x256xf32>
    %c0_2 = arith.constant 0 : index
    %c0_3 = arith.constant 0 : index
    %2 = vector.load %arg2[%c0_2, %c0_3] : memref<1x256xi32, #tpu.memory_space<vmem>>, vector<1x256xi32>
    %c0_4 = arith.constant 0 : index
    %c0_5 = arith.constant 0 : index
    %3 = vector.load %arg3[%c0_4, %c0_5] : memref<1x256xi32, #tpu.memory_space<vmem>>, vector<1x256xi32>
    %c17_i32 = arith.constant 17 : i32
    %4 = tpu.dynamic_rotate %1 by %c17_i32 dim 1 : vector<4x256xf32>, i32 -> vector<4x256xf32>
    %c0_i32 = arith.constant 0 : i32
    %5 = vector.broadcast %c0_i32 : i32 to vector<1x256xi32>
    %6 = arith.cmpi sgt, %2, %5 : vector<1x256xi32>
    %c0_i32_6 = arith.constant 0 : i32
    %7 = vector.broadcast %c0_i32_6 : i32 to vector<1x256xi32>
    %8 = arith.cmpi sgt, %3, %7 : vector<1x256xi32>
    %9 = arith.andi %6, %8 : vector<1x256xi1>
    %cst = arith.constant 0.000000e+00 : f32
    %10 = vector.shape_cast %9 : vector<1x256xi1> to vector<1x256xi1>
    %11 = vector.broadcast %10 : vector<1x256xi1> to vector<4x256xi1>
    %12 = vector.broadcast %cst : f32 to vector<4x256xf32>
    %13 = arith.select %11, %4, %12 : vector<4x256xi1>, vector<4x256xf32>
    %c0_7 = arith.constant 0 : index
    %c0_8 = arith.constant 0 : index
    %c0_9 = arith.constant 0 : index
    %14 = vector.load %arg4[%c0_7, %c0_8, %c0_9] : memref<9x4x4xf32, #tpu.memory_space<vmem>>, vector<1x4x4xf32>
    %15 = vector.shape_cast %14 : vector<1x4x4xf32> to vector<4x4xf32>
    %cst_10 = arith.constant dense<0.000000e+00> : vector<4x256xf32>
    %16 = tpu.matmul %15, %13, %cst_10 {dimension_numbers = #tpu.dot_dimension_numbers<[1], [0], [0], [1], [0, 0, 1, 1], [], []>} : vector<4x4xf32>, vector<4x256xf32>, vector<4x256xf32> -> vector<4x256xf32>
    %c16_i32 = arith.constant 16 : i32
    %17 = tpu.dynamic_rotate %1 by %c16_i32 dim 1 : vector<4x256xf32>, i32 -> vector<4x256xf32>
    %c0_i32_11 = arith.constant 0 : i32
    %18 = vector.broadcast %c0_i32_11 : i32 to vector<1x256xi32>
    %19 = arith.cmpi sgt, %2, %18 : vector<1x256xi32>
    %cst_12 = arith.constant 0.000000e+00 : f32
    %20 = vector.shape_cast %19 : vector<1x256xi1> to vector<1x256xi1>
    %21 = vector.broadcast %20 : vector<1x256xi1> to vector<4x256xi1>
    %22 = vector.broadcast %cst_12 : f32 to vector<4x256xf32>
    %23 = arith.select %21, %17, %22 : vector<4x256xi1>, vector<4x256xf32>
    %c1 = arith.constant 1 : index
    %c0_13 = arith.constant 0 : index
    %c0_14 = arith.constant 0 : index
    %24 = vector.load %arg4[%c1, %c0_13, %c0_14] : memref<9x4x4xf32, #tpu.memory_space<vmem>>, vector<1x4x4xf32>
    %25 = vector.shape_cast %24 : vector<1x4x4xf32> to vector<4x4xf32>
    %cst_15 = arith.constant dense<0.000000e+00> : vector<4x256xf32>
    %26 = tpu.matmul %25, %23, %cst_15 {dimension_numbers = #tpu.dot_dimension_numbers<[1], [0], [0], [1], [0, 0, 1, 1], [], []>} : vector<4x4xf32>, vector<4x256xf32>, vector<4x256xf32> -> vector<4x256xf32>
    %27 = arith.addf %16, %26 : vector<4x256xf32>
    %c15_i32 = arith.constant 15 : i32
    %28 = tpu.dynamic_rotate %1 by %c15_i32 dim 1 : vector<4x256xf32>, i32 -> vector<4x256xf32>
    %c0_i32_16 = arith.constant 0 : i32
    %29 = vector.broadcast %c0_i32_16 : i32 to vector<1x256xi32>
    %30 = arith.cmpi sgt, %2, %29 : vector<1x256xi32>
    %c15_i32_17 = arith.constant 15 : i32
    %31 = vector.broadcast %c15_i32_17 : i32 to vector<1x256xi32>
    %32 = arith.cmpi slt, %3, %31 : vector<1x256xi32>
    %33 = arith.andi %30, %32 : vector<1x256xi1>
    %cst_18 = arith.constant 0.000000e+00 : f32
    %34 = vector.shape_cast %33 : vector<1x256xi1> to vector<1x256xi1>
    %35 = vector.broadcast %34 : vector<1x256xi1> to vector<4x256xi1>
    %36 = vector.broadcast %cst_18 : f32 to vector<4x256xf32>
    %37 = arith.select %35, %28, %36 : vector<4x256xi1>, vector<4x256xf32>
    %c2 = arith.constant 2 : index
    %c0_19 = arith.constant 0 : index
    %c0_20 = arith.constant 0 : index
    %38 = vector.load %arg4[%c2, %c0_19, %c0_20] : memref<9x4x4xf32, #tpu.memory_space<vmem>>, vector<1x4x4xf32>
    %39 = vector.shape_cast %38 : vector<1x4x4xf32> to vector<4x4xf32>
    %cst_21 = arith.constant dense<0.000000e+00> : vector<4x256xf32>
    %40 = tpu.matmul %39, %37, %cst_21 {dimension_numbers = #tpu.dot_dimension_numbers<[1], [0], [0], [1], [0, 0, 1, 1], [], []>} : vector<4x4xf32>, vector<4x256xf32>, vector<4x256xf32> -> vector<4x256xf32>
    %41 = arith.addf %27, %40 : vector<4x256xf32>
    %c1_i32 = arith.constant 1 : i32
    %42 = tpu.dynamic_rotate %1 by %c1_i32 dim 1 : vector<4x256xf32>, i32 -> vector<4x256xf32>
    %c0_i32_22 = arith.constant 0 : i32
    %43 = vector.broadcast %c0_i32_22 : i32 to vector<1x256xi32>
    %44 = arith.cmpi sgt, %3, %43 : vector<1x256xi32>
    %cst_23 = arith.constant 0.000000e+00 : f32
    %45 = vector.shape_cast %44 : vector<1x256xi1> to vector<1x256xi1>
    %46 = vector.broadcast %45 : vector<1x256xi1> to vector<4x256xi1>
    %47 = vector.broadcast %cst_23 : f32 to vector<4x256xf32>
    %48 = arith.select %46, %42, %47 : vector<4x256xi1>, vector<4x256xf32>
    %c3 = arith.constant 3 : index
    %c0_24 = arith.constant 0 : index
    %c0_25 = arith.constant 0 : index
    %49 = vector.load %arg4[%c3, %c0_24, %c0_25] : memref<9x4x4xf32, #tpu.memory_space<vmem>>, vector<1x4x4xf32>
    %50 = vector.shape_cast %49 : vector<1x4x4xf32> to vector<4x4xf32>
    %cst_26 = arith.constant dense<0.000000e+00> : vector<4x256xf32>
    %51 = tpu.matmul %50, %48, %cst_26 {dimension_numbers = #tpu.dot_dimension_numbers<[1], [0], [0], [1], [0, 0, 1, 1], [], []>} : vector<4x4xf32>, vector<4x256xf32>, vector<4x256xf32> -> vector<4x256xf32>
    %52 = arith.addf %41, %51 : vector<4x256xf32>
    %c4 = arith.constant 4 : index
    %c0_27 = arith.constant 0 : index
    %c0_28 = arith.constant 0 : index
    %53 = vector.load %arg4[%c4, %c0_27, %c0_28] : memref<9x4x4xf32, #tpu.memory_space<vmem>>, vector<1x4x4xf32>
    %54 = vector.shape_cast %53 : vector<1x4x4xf32> to vector<4x4xf32>
    %cst_29 = arith.constant dense<0.000000e+00> : vector<4x256xf32>
    %55 = tpu.matmul %54, %1, %cst_29 {dimension_numbers = #tpu.dot_dimension_numbers<[1], [0], [0], [1], [0, 0, 1, 1], [], []>} : vector<4x4xf32>, vector<4x256xf32>, vector<4x256xf32> -> vector<4x256xf32>
    %56 = arith.addf %52, %55 : vector<4x256xf32>
    %c255_i32 = arith.constant 255 : i32
    %57 = tpu.dynamic_rotate %1 by %c255_i32 dim 1 : vector<4x256xf32>, i32 -> vector<4x256xf32>
    %c15_i32_30 = arith.constant 15 : i32
    %58 = vector.broadcast %c15_i32_30 : i32 to vector<1x256xi32>
    %59 = arith.cmpi slt, %3, %58 : vector<1x256xi32>
    %cst_31 = arith.constant 0.000000e+00 : f32
    %60 = vector.shape_cast %59 : vector<1x256xi1> to vector<1x256xi1>
    %61 = vector.broadcast %60 : vector<1x256xi1> to vector<4x256xi1>
    %62 = vector.broadcast %cst_31 : f32 to vector<4x256xf32>
    %63 = arith.select %61, %57, %62 : vector<4x256xi1>, vector<4x256xf32>
    %c5 = arith.constant 5 : index
    %c0_32 = arith.constant 0 : index
    %c0_33 = arith.constant 0 : index
    %64 = vector.load %arg4[%c5, %c0_32, %c0_33] : memref<9x4x4xf32, #tpu.memory_space<vmem>>, vector<1x4x4xf32>
    %65 = vector.shape_cast %64 : vector<1x4x4xf32> to vector<4x4xf32>
    %cst_34 = arith.constant dense<0.000000e+00> : vector<4x256xf32>
    %66 = tpu.matmul %65, %63, %cst_34 {dimension_numbers = #tpu.dot_dimension_numbers<[1], [0], [0], [1], [0, 0, 1, 1], [], []>} : vector<4x4xf32>, vector<4x256xf32>, vector<4x256xf32> -> vector<4x256xf32>
    %67 = arith.addf %56, %66 : vector<4x256xf32>
    %c241_i32 = arith.constant 241 : i32
    %68 = tpu.dynamic_rotate %1 by %c241_i32 dim 1 : vector<4x256xf32>, i32 -> vector<4x256xf32>
    %c15_i32_35 = arith.constant 15 : i32
    %69 = vector.broadcast %c15_i32_35 : i32 to vector<1x256xi32>
    %70 = arith.cmpi slt, %2, %69 : vector<1x256xi32>
    %c0_i32_36 = arith.constant 0 : i32
    %71 = vector.broadcast %c0_i32_36 : i32 to vector<1x256xi32>
    %72 = arith.cmpi sgt, %3, %71 : vector<1x256xi32>
    %73 = arith.andi %70, %72 : vector<1x256xi1>
    %cst_37 = arith.constant 0.000000e+00 : f32
    %74 = vector.shape_cast %73 : vector<1x256xi1> to vector<1x256xi1>
    %75 = vector.broadcast %74 : vector<1x256xi1> to vector<4x256xi1>
    %76 = vector.broadcast %cst_37 : f32 to vector<4x256xf32>
    %77 = arith.select %75, %68, %76 : vector<4x256xi1>, vector<4x256xf32>
    %c6 = arith.constant 6 : index
    %c0_38 = arith.constant 0 : index
    %c0_39 = arith.constant 0 : index
    %78 = vector.load %arg4[%c6, %c0_38, %c0_39] : memref<9x4x4xf32, #tpu.memory_space<vmem>>, vector<1x4x4xf32>
    %79 = vector.shape_cast %78 : vector<1x4x4xf32> to vector<4x4xf32>
    %cst_40 = arith.constant dense<0.000000e+00> : vector<4x256xf32>
    %80 = tpu.matmul %79, %77, %cst_40 {dimension_numbers = #tpu.dot_dimension_numbers<[1], [0], [0], [1], [0, 0, 1, 1], [], []>} : vector<4x4xf32>, vector<4x256xf32>, vector<4x256xf32> -> vector<4x256xf32>
    %81 = arith.addf %67, %80 : vector<4x256xf32>
    %c240_i32 = arith.constant 240 : i32
    %82 = tpu.dynamic_rotate %1 by %c240_i32 dim 1 : vector<4x256xf32>, i32 -> vector<4x256xf32>
    %c15_i32_41 = arith.constant 15 : i32
    %83 = vector.broadcast %c15_i32_41 : i32 to vector<1x256xi32>
    %84 = arith.cmpi slt, %2, %83 : vector<1x256xi32>
    %cst_42 = arith.constant 0.000000e+00 : f32
    %85 = vector.shape_cast %84 : vector<1x256xi1> to vector<1x256xi1>
    %86 = vector.broadcast %85 : vector<1x256xi1> to vector<4x256xi1>
    %87 = vector.broadcast %cst_42 : f32 to vector<4x256xf32>
    %88 = arith.select %86, %82, %87 : vector<4x256xi1>, vector<4x256xf32>
    %c7 = arith.constant 7 : index
    %c0_43 = arith.constant 0 : index
    %c0_44 = arith.constant 0 : index
    %89 = vector.load %arg4[%c7, %c0_43, %c0_44] : memref<9x4x4xf32, #tpu.memory_space<vmem>>, vector<1x4x4xf32>
    %90 = vector.shape_cast %89 : vector<1x4x4xf32> to vector<4x4xf32>
    %cst_45 = arith.constant dense<0.000000e+00> : vector<4x256xf32>
    %91 = tpu.matmul %90, %88, %cst_45 {dimension_numbers = #tpu.dot_dimension_numbers<[1], [0], [0], [1], [0, 0, 1, 1], [], []>} : vector<4x4xf32>, vector<4x256xf32>, vector<4x256xf32> -> vector<4x256xf32>
    %92 = arith.addf %81, %91 : vector<4x256xf32>
    %c239_i32 = arith.constant 239 : i32
    %93 = tpu.dynamic_rotate %1 by %c239_i32 dim 1 : vector<4x256xf32>, i32 -> vector<4x256xf32>
    %c15_i32_46 = arith.constant 15 : i32
    %94 = vector.broadcast %c15_i32_46 : i32 to vector<1x256xi32>
    %95 = arith.cmpi slt, %2, %94 : vector<1x256xi32>
    %c15_i32_47 = arith.constant 15 : i32
    %96 = vector.broadcast %c15_i32_47 : i32 to vector<1x256xi32>
    %97 = arith.cmpi slt, %3, %96 : vector<1x256xi32>
    %98 = arith.andi %95, %97 : vector<1x256xi1>
    %cst_48 = arith.constant 0.000000e+00 : f32
    %99 = vector.shape_cast %98 : vector<1x256xi1> to vector<1x256xi1>
    %100 = vector.broadcast %99 : vector<1x256xi1> to vector<4x256xi1>
    %101 = vector.broadcast %cst_48 : f32 to vector<4x256xf32>
    %102 = arith.select %100, %93, %101 : vector<4x256xi1>, vector<4x256xf32>
    %c8 = arith.constant 8 : index
    %c0_49 = arith.constant 0 : index
    %c0_50 = arith.constant 0 : index
    %103 = vector.load %arg4[%c8, %c0_49, %c0_50] : memref<9x4x4xf32, #tpu.memory_space<vmem>>, vector<1x4x4xf32>
    %104 = vector.shape_cast %103 : vector<1x4x4xf32> to vector<4x4xf32>
    %cst_51 = arith.constant dense<0.000000e+00> : vector<4x256xf32>
    %105 = tpu.matmul %104, %102, %cst_51 {dimension_numbers = #tpu.dot_dimension_numbers<[1], [0], [0], [1], [0, 0, 1, 1], [], []>} : vector<4x4xf32>, vector<4x256xf32>, vector<4x256xf32> -> vector<4x256xf32>
    %106 = arith.addf %92, %105 : vector<4x256xf32>
    %cst_52 = arith.constant 5.000000e-01 : f32
    %107 = vector.broadcast %cst_52 : f32 to vector<4x256xf32>
    %108 = arith.mulf %107, %106 : vector<4x256xf32>
    %cst_53 = arith.constant 0.707106769 : f32
    %109 = vector.broadcast %cst_53 : f32 to vector<4x256xf32>
    %110 = arith.mulf %106, %109 : vector<4x256xf32>
    %111 = math.absf %110 : vector<4x256xf32>
    %cst_54 = arith.constant 0.327591091 : f32
    %112 = vector.broadcast %cst_54 : f32 to vector<4x256xf32>
    %113 = arith.mulf %112, %111 : vector<4x256xf32>
    %cst_55 = arith.constant 1.000000e+00 : f32
    %114 = vector.broadcast %cst_55 : f32 to vector<4x256xf32>
    %115 = arith.addf %114, %113 : vector<4x256xf32>
    %cst_56 = arith.constant 1.000000e+00 : f32
    %116 = vector.broadcast %cst_56 : f32 to vector<4x256xf32>
    %117 = arith.divf %116, %115 : vector<4x256xf32>
    %cst_57 = arith.constant 1.06140542 : f32
    %118 = vector.broadcast %cst_57 : f32 to vector<4x256xf32>
    %119 = arith.mulf %118, %117 : vector<4x256xf32>
    %cst_58 = arith.constant -1.45315206 : f32
    %120 = vector.broadcast %cst_58 : f32 to vector<4x256xf32>
    %121 = arith.addf %119, %120 : vector<4x256xf32>
    %122 = arith.mulf %121, %117 : vector<4x256xf32>
    %cst_59 = arith.constant 1.42141378 : f32
    %123 = vector.broadcast %cst_59 : f32 to vector<4x256xf32>
    %124 = arith.addf %122, %123 : vector<4x256xf32>
    %125 = arith.mulf %124, %117 : vector<4x256xf32>
    %cst_60 = arith.constant -0.284496725 : f32
    %126 = vector.broadcast %cst_60 : f32 to vector<4x256xf32>
    %127 = arith.addf %125, %126 : vector<4x256xf32>
    %128 = arith.mulf %127, %117 : vector<4x256xf32>
    %cst_61 = arith.constant 0.254829586 : f32
    %129 = vector.broadcast %cst_61 : f32 to vector<4x256xf32>
    %130 = arith.addf %128, %129 : vector<4x256xf32>
    %131 = arith.mulf %130, %117 : vector<4x256xf32>
    %132 = arith.mulf %111, %111 : vector<4x256xf32>
    %cst_62 = arith.constant 0.000000e+00 : f32
    %133 = vector.broadcast %cst_62 : f32 to vector<4x256xf32>
    %134 = arith.subf %133, %132 : vector<4x256xf32>
    %135 = math.exp %134 : vector<4x256xf32>
    %136 = arith.mulf %131, %135 : vector<4x256xf32>
    %cst_63 = arith.constant 1.000000e+00 : f32
    %137 = vector.broadcast %cst_63 : f32 to vector<4x256xf32>
    %138 = arith.subf %137, %136 : vector<4x256xf32>
    %cst_64 = arith.constant 0.000000e+00 : f32
    %139 = vector.broadcast %cst_64 : f32 to vector<4x256xf32>
    %140 = arith.cmpf olt, %110, %139 : vector<4x256xf32>
    %cst_65 = arith.constant 0.000000e+00 : f32
    %141 = vector.broadcast %cst_65 : f32 to vector<4x256xf32>
    %142 = arith.subf %141, %138 : vector<4x256xf32>
    %143 = arith.select %140, %142, %138 : vector<4x256xi1>, vector<4x256xf32>
    %cst_66 = arith.constant 1.000000e+00 : f32
    %144 = vector.broadcast %cst_66 : f32 to vector<4x256xf32>
    %145 = arith.addf %144, %143 : vector<4x256xf32>
    %146 = arith.mulf %108, %145 : vector<4x256xf32>
    %147 = arith.addf %146, %1 : vector<4x256xf32>
    %c0_67 = arith.constant 0 : index
    %c0_68 = arith.constant 0 : index
    %148 = vector.load %arg5[%c0_67, %c0_68] : memref<16x4xf32, #tpu.memory_space<vmem>>, vector<16x4xf32>
    %cst_69 = arith.constant dense<0.000000e+00> : vector<16x256xf32>
    %149 = tpu.matmul %148, %147, %cst_69 {dimension_numbers = #tpu.dot_dimension_numbers<[1], [0], [0], [1], [0, 0, 1, 1], [], []>} : vector<16x4xf32>, vector<4x256xf32>, vector<16x256xf32> -> vector<16x256xf32>
    %c0_70 = arith.constant 0 : index
    %c0_71 = arith.constant 0 : index
    %150 = vector.load %arg6[%c0_70, %c0_71] : memref<16x1xf32, #tpu.memory_space<vmem>>, vector<16x1xf32>
    %151 = vector.broadcast %150 : vector<16x1xf32> to vector<16x256xf32>
    %152 = arith.addf %149, %151 : vector<16x256xf32>
    %cst_72 = arith.constant 5.000000e-01 : f32
    %153 = vector.broadcast %cst_72 : f32 to vector<16x256xf32>
    %154 = arith.mulf %153, %152 : vector<16x256xf32>
    %cst_73 = arith.constant 0.707106769 : f32
    %155 = vector.broadcast %cst_73 : f32 to vector<16x256xf32>
    %156 = arith.mulf %152, %155 : vector<16x256xf32>
    %157 = math.absf %156 : vector<16x256xf32>
    %cst_74 = arith.constant 0.327591091 : f32
    %158 = vector.broadcast %cst_74 : f32 to vector<16x256xf32>
    %159 = arith.mulf %158, %157 : vector<16x256xf32>
    %cst_75 = arith.constant 1.000000e+00 : f32
    %160 = vector.broadcast %cst_75 : f32 to vector<16x256xf32>
    %161 = arith.addf %160, %159 : vector<16x256xf32>
    %cst_76 = arith.constant 1.000000e+00 : f32
    %162 = vector.broadcast %cst_76 : f32 to vector<16x256xf32>
    %163 = arith.divf %162, %161 : vector<16x256xf32>
    %cst_77 = arith.constant 1.06140542 : f32
    %164 = vector.broadcast %cst_77 : f32 to vector<16x256xf32>
    %165 = arith.mulf %164, %163 : vector<16x256xf32>
    %cst_78 = arith.constant -1.45315206 : f32
    %166 = vector.broadcast %cst_78 : f32 to vector<16x256xf32>
    %167 = arith.addf %165, %166 : vector<16x256xf32>
    %168 = arith.mulf %167, %163 : vector<16x256xf32>
    %cst_79 = arith.constant 1.42141378 : f32
    %169 = vector.broadcast %cst_79 : f32 to vector<16x256xf32>
    %170 = arith.addf %168, %169 : vector<16x256xf32>
    %171 = arith.mulf %170, %163 : vector<16x256xf32>
    %cst_80 = arith.constant -0.284496725 : f32
    %172 = vector.broadcast %cst_80 : f32 to vector<16x256xf32>
    %173 = arith.addf %171, %172 : vector<16x256xf32>
    %174 = arith.mulf %173, %163 : vector<16x256xf32>
    %cst_81 = arith.constant 0.254829586 : f32
    %175 = vector.broadcast %cst_81 : f32 to vector<16x256xf32>
    %176 = arith.addf %174, %175 : vector<16x256xf32>
    %177 = arith.mulf %176, %163 : vector<16x256xf32>
    %178 = arith.mulf %157, %157 : vector<16x256xf32>
    %cst_82 = arith.constant 0.000000e+00 : f32
    %179 = vector.broadcast %cst_82 : f32 to vector<16x256xf32>
    %180 = arith.subf %179, %178 : vector<16x256xf32>
    %181 = math.exp %180 : vector<16x256xf32>
    %182 = arith.mulf %177, %181 : vector<16x256xf32>
    %cst_83 = arith.constant 1.000000e+00 : f32
    %183 = vector.broadcast %cst_83 : f32 to vector<16x256xf32>
    %184 = arith.subf %183, %182 : vector<16x256xf32>
    %cst_84 = arith.constant 0.000000e+00 : f32
    %185 = vector.broadcast %cst_84 : f32 to vector<16x256xf32>
    %186 = arith.cmpf olt, %156, %185 : vector<16x256xf32>
    %cst_85 = arith.constant 0.000000e+00 : f32
    %187 = vector.broadcast %cst_85 : f32 to vector<16x256xf32>
    %188 = arith.subf %187, %184 : vector<16x256xf32>
    %189 = arith.select %186, %188, %184 : vector<16x256xi1>, vector<16x256xf32>
    %cst_86 = arith.constant 1.000000e+00 : f32
    %190 = vector.broadcast %cst_86 : f32 to vector<16x256xf32>
    %191 = arith.addf %190, %189 : vector<16x256xf32>
    %192 = arith.mulf %154, %191 : vector<16x256xf32>
    %c0_87 = arith.constant 0 : index
    %c0_88 = arith.constant 0 : index
    %193 = vector.load %arg7[%c0_87, %c0_88] : memref<8x16xf32, #tpu.memory_space<vmem>>, vector<8x16xf32>
    %cst_89 = arith.constant dense<0.000000e+00> : vector<8x256xf32>
    %194 = tpu.matmul %193, %192, %cst_89 {dimension_numbers = #tpu.dot_dimension_numbers<[1], [0], [0], [1], [0, 0, 1, 1], [], []>} : vector<8x16xf32>, vector<16x256xf32>, vector<8x256xf32> -> vector<8x256xf32>
    %c0_90 = arith.constant 0 : index
    %c0_91 = arith.constant 0 : index
    %195 = vector.load %arg8[%c0_90, %c0_91] : memref<8x1xf32, #tpu.memory_space<vmem>>, vector<8x1xf32>
    %196 = vector.broadcast %195 : vector<8x1xf32> to vector<8x256xf32>
    %197 = arith.addf %194, %196 : vector<8x256xf32>
    %c0_92 = arith.constant 0 : index
    %c0_93 = arith.constant 0 : index
    %c0_94 = arith.constant 0 : index
    %198 = vector.load %arg9[%c0_92, %c0_93, %c0_94] : memref<1x8x256xf32, #tpu.memory_space<vmem>>, vector<1x8x256xf32>
    %199 = vector.shape_cast %198 : vector<1x8x256xf32> to vector<8x256xf32>
    %200 = vector.shape_cast %197 : vector<8x256xf32> to vector<1x8x256xf32>
    tpu.vector_store %arg9[%c0_92, %c0_93, %c0_94], %200 {strides = array<i32>} : memref<1x8x256xf32, #tpu.memory_space<vmem>>, vector<1x8x256xf32>,
    return
  }
  func.func @transform_0(%arg0: i32) -> (i32, i32, i32) {
    %c0_i32 = arith.constant 0 : i32
    %c0_i32_0 = arith.constant 0 : i32
    %c0_i32_1 = arith.constant 0 : i32
    return %arg0, %c0_i32, %c0_i32_0 : i32, i32, i32
  }
  func.func @transform_1(%arg0: i32) -> (i32, i32) {
    %c0_i32 = arith.constant 0 : i32
    %c0_i32_0 = arith.constant 0 : i32
    %c0_i32_1 = arith.constant 0 : i32
    return %c0_i32, %c0_i32_0 : i32, i32
  }
  func.func @transform_2(%arg0: i32) -> (i32, i32) {
    %c0_i32 = arith.constant 0 : i32
    %c0_i32_0 = arith.constant 0 : i32
    %c0_i32_1 = arith.constant 0 : i32
    return %c0_i32, %c0_i32_0 : i32, i32
  }
  func.func @transform_3(%arg0: i32) -> (i32, i32, i32) {
    %c0_i32 = arith.constant 0 : i32
    %c0_i32_0 = arith.constant 0 : i32
    %c0_i32_1 = arith.constant 0 : i32
    %c0_i32_2 = arith.constant 0 : i32
    return %c0_i32, %c0_i32_0, %c0_i32_1 : i32, i32, i32
  }
  func.func @transform_4(%arg0: i32) -> (i32, i32) {
    %c0_i32 = arith.constant 0 : i32
    %c0_i32_0 = arith.constant 0 : i32
    %c0_i32_1 = arith.constant 0 : i32
    return %c0_i32, %c0_i32_0 : i32, i32
  }
  func.func @transform_5(%arg0: i32) -> (i32, i32) {
    %c0_i32 = arith.constant 0 : i32
    %c0_i32_0 = arith.constant 0 : i32
    %c0_i32_1 = arith.constant 0 : i32
    return %c0_i32, %c0_i32_0 : i32, i32
  }
  func.func @transform_6(%arg0: i32) -> (i32, i32) {
    %c0_i32 = arith.constant 0 : i32
    %c0_i32_0 = arith.constant 0 : i32
    %c0_i32_1 = arith.constant 0 : i32
    return %c0_i32, %c0_i32_0 : i32, i32
  }
  func.func @transform_7(%arg0: i32) -> (i32, i32) {
    %c0_i32 = arith.constant 0 : i32
    %c0_i32_0 = arith.constant 0 : i32
    %c0_i32_1 = arith.constant 0 : i32
    return %c0_i32, %c0_i32_0 : i32, i32
  }
  func.func @transform_8(%arg0: i32) -> (i32, i32, i32) {
    %c0_i32 = arith.constant 0 : i32
    %c0_i32_0 = arith.constant 0 : i32
    %c0_i32_1 = arith.constant 0 : i32
    return %arg0, %c0_i32, %c0_i32_0 : i32, i32, i32
  }
}

</mosaic_0001>

<bundles_post_ra>
// kernel: tile.9
= control target key start
LH: loop header
LB: loop body
LE: loop exit
PB: predicated region body
PF: predicated region fallthrough
CT: control target
= control target key end

     0   :  { %s7_s6 = smov 3  ;;  %s21_s9 = smov 3  ;;  %vm4_vm0 = vcmask 130048   ;;  %vm11_vm1 = vcmask 1048448   ;;  %vm18_vm2 = vcmask 917248   ;;  %vm25_vm3 = vcmask 786048   ;;  %s128_s0 = inlined_call_operand.vmem [shape: s32[16,16], index: 0, kind: input, shape index: {}]   ;;  %s129_s1 = inlined_call_operand.vmem [shape: s32[1,256], index: 1, kind: output, shape index: {}]  }
   0x1   :  { %v66_v0 = vld [vmem:[%s128_s0 + $0x7] ss:$8 sm:%s7_s6]   ;;  %s81_s10 = smov 112   ;;  %v68_v1 = vld [vmem:[%s128_s0 + $0x5] ss:$8 sm:%s21_s9]   ;;  %s14_s13 = smov 3 }
   0x2   :  { %9 = vrot.lane.b32.xlu0 %v66_v0, %s81_s10  ;;  %s82_s14 = smov 80   ;;  %v67_v2 = vld [vmem:[%s128_s0 + $0x6] ss:$8 sm:%s14_s13]   ;;  %s28_s17 = smov 3  ;;  %vm32_vm4 = vcmask 654848   ;;  %vm39_vm5 = vcmask 523648  }
   0x3   :  { %23 = vrot.lane.b32.xlu1 %v68_v1, %s82_s14  ;;  %v69_v3 = vld [vmem:[%s128_s0 + $0x4] ss:$8 sm:%s28_s17]   ;;  %s35_s20 = smov 3  ;;  %s42_s21 = smov 3  ;;  %vm46_vm6 = vcmask 392448   ;;  %vm53_vm7 = vcmask 261248  }
   0x4   :  { %s83_s22 = smov 96   ;;  %s84_s23 = smov 64   ;;  %v70_v4 = vld [vmem:[%s128_s0 + $0x3] ss:$8 sm:%s35_s20]   ;;  %v71_v5 = vld [vmem:[%s128_s0 + $0x2] ss:$8 sm:%s42_s21]  }
   0x5   :  { %s2_s26 = smov 3  ;;  %s49_s29 = smov 3 }
   0x6   :  { %16 = vrot.lane.b32.xlu0 %v67_v2, %s83_s22  ;;  %v3_v6 = vld [vmem:[%s128_s0] ss:$8 sm:%s2_s26]   ;;  %s85_s3 = smov 48   ;;  %s86_s4 = smov 32  }
   0x7   :  { %30 = vrot.lane.b32.xlu1 %v69_v3, %s84_s23  ;;  %5 = vst.msk [vmem:[#allocation0] ss:$8 sm:$0x3] %vm4_vm0, %v3_v6   ;;  %v72_v7 = vld [vmem:[%s128_s0 + $0x1] ss:$8 sm:%s49_s29]   ;;  %s87_s0 = smov 16  }
   0xa   :  { %37 = vrot.lane.b32.xlu0 %v70_v4, %s85_s3 }
   0xb   :  { %44 = vrot.lane.b32.xlu1 %v71_v5, %s86_s4 }
   0xe   :  { %51 = vrot.lane.b32.xlu0 %v72_v7, %s87_s0 }
  0x74   :  { %v10_v8 = vpop.permute.xlu0 %9  }
  0x75   :  { %12 = vst.msk [vmem:[#allocation0] ss:$8 sm:$0x3] %vm11_vm1, %v10_v8   ;;  %v24_v9 = vpop.permute.xlu1 %23  }
  0x78   :  { %v17_v10 = vpop.permute.xlu0 %16  }
  0x79   :  { %19 = vst.msk [vmem:[#allocation0] ss:$8 sm:$0x3] %vm18_vm2, %v17_v10   ;;  %v31_v11 = vpop.permute.xlu1 %30  }
  0x7a   :  { %26 = vst.msk [vmem:[#allocation0] ss:$8 sm:$0x3] %vm25_vm3, %v24_v9  }
  0x7b   :  { %33 = vst.msk [vmem:[#allocation0] ss:$8 sm:$0x3] %vm32_vm4, %v31_v11  }
  0x7c   :  { %v38_v12 = vpop.permute.xlu0 %37  }
  0x7d   :  { %40 = vst.msk [vmem:[#allocation0] ss:$8 sm:$0x3] %vm39_vm5, %v38_v12   ;;  %v45_v13 = vpop.permute.xlu1 %44  }
  0x7e   :  { %47 = vst.msk [vmem:[#allocation0] ss:$8 sm:$0x3] %vm46_vm6, %v45_v13  }
  0x80   :  { %v52_v14 = vpop.permute.xlu0 %51  }
  0x81   :  { %54 = vst.msk [vmem:[#allocation0] ss:$8 sm:$0x3] %vm53_vm7, %v52_v14  }
  0x88   :  { %v58_v15 = vld [vmem:[#allocation0] sm:$0x1]  ;;  %v62_v16 = vld [vmem:[#allocation0 + $0x8] sm:$0x1] }
  0x89   :  { %60 = vst [vmem:[%s129_s1] sm:$0x1] %v58_v15  ;;  %73 = vst [vmem:[%s129_s1 + $0x1] sm:$0x1] %v62_v16 }

// kernel: irmlp_forward.1
= control target key start
LH: loop header
LB: loop body
LE: loop exit
PB: predicated region body
PF: predicated region fallthrough
CT: control target
= control target key end

     0   :  { %s1820_s27 = smov 0   ;;  %s2159_s0 = inlined_call_operand.vmem [shape: f32[2,4,256], index: 0, kind: input, shape index: {}]   ;;  %s2160_s1 = inlined_call_operand.vmem [shape: s32[1,256], index: 1, kind: input, shape index: {}]   ;;  %s2161_s2 = inlined_call_operand.vmem [shape: s32[1,256], index: 2, kind: input, shape index: {}]   ;;  %s2162_s3 = inlined_call_operand.vmem [shape: f32[9,4,4], index: 3, kind: input, shape index: {}]   ;;  %s2163_s4 = inlined_call_operand.vmem [shape: f32[16,4], index: 4, kind: input, shape index: {}]   ;;  %s2164_s5 = inlined_call_operand.vmem [shape: f32[16,1], index: 5, kind: input, shape index: {}]   ;;  %s2165_s6 = inlined_call_operand.vmem [shape: f32[8,16], index: 6, kind: input, shape index: {}]   ;;  %s2166_s7 = inlined_call_operand.vmem [shape: f32[8,1], index: 7, kind: input, shape index: {}]   ;;  %s2167_s8 = inlined_call_operand.vmem [shape: f32[2,8,256], index: 8, kind: output, shape index: {}]  }
   0x1 LB: > { %s1639_s28 = sadd.s32 4294967295, %s1763_s27   ;;  %p1643_p0 = scmp.ge.s32.totalorder %s1763_s27, 1  ;;  %s1763_s27 = sphi %s1820_s27, %s18_s27  }
   0x2   : > { %p262_p1 = scmp.lt.s32.totalorder %s1763_s27, 3 }
   0x4   : > { %p263_p2 = pnand %p1643_p0, %p262_p1 }
   0x5   : > { %p296_p3 = scmp.lt.s32.totalorder (!%p263_p2), %s1639_s28, 1  ;;  %v1765_v0 = vmov (!%p263_p2), 0   ;;  %v1766_v1 = vmov (!%p263_p2), 0.0   ;;  %s1767_s11 = smov (!%p263_p2), 1   ;;  %v316_v4 = vlaneseq (!%p263_p2)  ;;  %v1863_v5 = vld [vmem:[%s2161_s2] sm:$0x3] (!%p263_p2) }
   0x6   : > { %266 = sbr.rel (%p263_p2) target bundleno = 936 (0x3a8), region = 52  ;;  %1730 = vset.pattern.permute.xlu0 (!%p263_p2), %v1765_v0  ;;  %1731 = vset.pattern.permute.xlu1 (!%p263_p2), %v1765_v0  ;;  %s1768_s12 = smov (!%p263_p2), 127   ;;  %vm322_vm0 = vcmp.gt.s32.totalorder (!%p263_p2), %v1863_v5, 0  ;;  %v1869_v7 = vld [vmem:[%s2160_s1] sm:$0x3] (!%p263_p2)  ;;  %vm529_vm1 = vcmp.lt.s32.totalorder (!%p263_p2), %v1863_v5, 15 }
   0x7   : > { %723 = vmatprep.mubr.f32.mxu0 (!%p263_p2), %v1766_v1  ;;  %435 = vmatprep.mubr.f32.mxu1 (!%p263_p2), %v1766_v1  ;;  %s1769_s13 = smov (!%p263_p2), 16   ;;  %s1770_s14 = smov (!%p263_p2), 113   ;;  %v326_v6 = vshrl.u32 (!%p263_p2), %v316_v4, 7  ;;  %v635_v10 = vsel (!%p263_p2), %vm322_vm0, 1, %v1765_v0  ;;  %vm321_vm2 = vcmp.gt.s32.totalorder (!%p263_p2), %v1869_v7, 0  ;;  %v1880_v11 = vand.u32 (!%p263_p2), 127, %v316_v4 }
   0x8   : > { %s1771_s15 = smov (!%p263_p2), 17   ;;  %s1772_s16 = smov (!%p263_p2), 112   ;;  %v821_v12 = vsel (!%p263_p2), %vm529_vm1, 1, %v1765_v0  ;;  %v345_v17 = vsel (!%p263_p2), %vm321_vm2, 1, %v1765_v0  ;;  %vm925_vm3 = vcmp.lt.s32.totalorder (!%p263_p2), %v1869_v7, 15  ;;  %vm364_vm9 = vcmask (!%p263_p2), 1043456   ;;  %vm323_vm12 = vmand (!%p263_p2), %vm321_vm2, %vm322_vm0 }
   0x9   : > { %s1773_s17 = smov (!%p263_p2), 15   ;;  %s1774_s18 = smov (!%p263_p2), 111   ;;  %v1871_v8 = vsub.s32 (!%p263_p2), 0, %v326_v6  ;;  %v1873_v9 = vsub.s32 (!%p263_p2), 1, %v326_v6  ;;  %vm632_vm4 = vcmp.lt.s32.totalorder (!%p263_p2), %v1880_v11, 1  ;;  %vm818_vm5 = vcmp.lt.s32.totalorder (!%p263_p2), %v1880_v11, 127  ;;  %vm926_vm8 = vmand (!%p263_p2), %vm925_vm3, %vm322_vm0 }
   0xa   : > { %vm360_vm10 = vcmask (!%p263_p2), 31744   ;;  %v1659_v31 = vld [vmem:[%s2162_s3 + $0xc] sm:$0xf] (!%p263_p2)  ;;  %vm342_vm13 = vcmp.lt.s32.totalorder (!%p263_p2), %v1880_v11, 16  ;;  %v927_v32 = vsel (!%p263_p2), %vm926_vm8, 1, %v1765_v0  ;;  %v324_v39 = vsel (!%p263_p2), %vm323_vm12, 1, %v1765_v0  ;;  %vm1135_vm12 = vmand (!%p263_p2), %vm925_vm3, %vm529_vm1 }
   0xb   : > { %v643_v13 = vrot.slane (!%p263_p2), %v635_v10, %v1873_v9  ;;  %v639_v14 = vrot.slane (!%p263_p2), %v635_v10, %v1871_v8  ;;  %v829_v18 = vrot.slane (!%p263_p2), %v821_v12, %v1873_v9  ;;  %v353_v21 = vrot.slane (!%p263_p2), %v345_v17, %v1873_v9  ;;  %v1648_v45 = vld [vmem:[%s2162_s3 + $0x4] sm:$0xf] (!%p263_p2)  ;;  %v1663_v54 = vld [vmem:[%s2162_s3 + $0x10] sm:$0xf] (!%p263_p2)  ;;  %v1667_v7 = vld [vmem:[%s2162_s3 + $0x14] sm:$0xf] (!%p263_p2) }
   0xc   : > { %v349_v22 = vrot.slane (!%p263_p2), %v345_v17, %v1871_v8  ;;  %v825_v35 = vrot.slane (!%p263_p2), %v821_v12, %v1871_v8  ;;  %v935_v42 = vrot.slane (!%p263_p2), %v927_v32, %v1873_v9  ;;  %vm922_vm0 = vcmp.lt.s32.totalorder (!%p263_p2), %v1880_v11, 113  ;;  %v1655_v34 = vld [vmem:[%s2162_s3 + $0x8] sm:$0xf] (!%p263_p2) }
   0xd   : > { %s2195_s28 = smov (!%p296_p3, %s1639_s28), 1  ;;  %vm1894_vm6 = vcmp.eq.s32.totalorder %v643_v13, 1  ;;  %vm1898_vm7 = vcmp.eq.s32.totalorder %v639_v14, 1  ;;  %vm1908_vm11 = vcmp.eq.s32.totalorder %v829_v18, 1  ;;  %vm1928_vm14 = vcmp.eq.s32.totalorder %v353_v21, 1 }
   0xe   : > { %s1690_s29 = sshll.u32 %s2195_s28, 3  ;;  %vm1932_vm15 = vcmp.eq.s32.totalorder %v349_v22, 1  ;;  %v328_v46 = vrot.slane %v324_v39, %v1871_v8  ;;  %v332_v47 = vrot.slane %v324_v39, %v1873_v9  ;;  %v1031_v55 = vsel %vm925_vm3, 1, %v1765_v0  ;;  %v337_v14 = vld [vmem:[%s2162_s3] sm:$0xf] }
   0xf   : > { %s300_s10 = scalar_lea.vmem %s2159_s0, %s1690_s29  ;;  %v931_v59 = vrot.slane %v927_v32, %v1871_v8  ;;  %v1039_v10 = vrot.slane %v1031_v55, %v1873_v9  ;;  %v1136_v22 = vsel %vm1135_vm12, 1, %v1765_v0  ;;  %v1035_v26 = vrot.slane %v1031_v55, %v1871_v8 }
  0x10   : > { %v1838_v2 = vld [vmem:[%s300_s10] sm:$0xff]  ;;  %vm1988_vm8 = vcmp.eq.s32.totalorder %v328_v46, 1  ;;  %vm1507_vm12 = vcmask 130048  }
  0x11   : > { %628 = vrot.lane.b32.xlu0 %v1838_v2, %s1767_s11  ;;  %814 = vrot.lane.b32.xlu1 %v1838_v2, %s1768_s12  ;;  %v1844_v3 = vcombine.high %v1838_v2, %v1838_v2  ;;  %v1501_v46 = vld [vmem:[%s2166_s7] sm:$0xff] }
  0x15   : > { %630 = vrot.lane.b32.xlu0 %v1844_v3, %s1767_s11  ;;  %816 = vrot.lane.b32.xlu1 %v1844_v3, %s1768_s12 }
  0x19   : > { %340 = vrot.lane.b32.xlu1 %v1844_v3, %s1769_s13  ;;  %338 = vrot.lane.b32.xlu0 %v1838_v2, %s1769_s13  ;;  %s1691_s13 = sshll.u32 %s2195_s28, 4 }
  0x1d   : > { %920 = vrot.lane.b32.xlu1 %v1844_v3, %s1770_s14  ;;  %918 = vrot.lane.b32.xlu0 %v1838_v2, %s1770_s14 }
  0x21   : > { %314 = vrot.lane.b32.xlu1 %v1844_v3, %s1771_s15  ;;  %312 = vrot.lane.b32.xlu0 %v1838_v2, %s1771_s15 }
  0x25   : > { %1026 = vrot.lane.b32.xlu1 %v1844_v3, %s1772_s16  ;;  %1024 = vrot.lane.b32.xlu0 %v1838_v2, %s1772_s16  ;;  %s305_s16 = scalar_lea.vmem %s2167_s8, %s1691_s13 }
  0x29   : > { %524 = vrot.lane.b32.xlu1 %v1844_v3, %s1773_s17  ;;  %522 = vrot.lane.b32.xlu0 %v1838_v2, %s1773_s17 }
  0x2d   : > { %1130 = vrot.lane.b32.xlu1 %v1844_v3, %s1774_s18  ;;  %1128 = vrot.lane.b32.xlu0 %v1838_v2, %s1774_s18 }
  0x83   : > { %v629_v15 = vpop.permute.xlu0 %628  ;;  %v815_v16 = vpop.permute.xlu1 %814 }
  0x87   : > { %v631_v23 = vpop.permute.xlu0 %630  ;;  %v817_v24 = vpop.permute.xlu1 %816 }
  0x88   : > { %v634_v25 = vsel %vm632_vm4, %v631_v23, %v629_v15  ;;  %v820_v27 = vsel %vm818_vm5, %v817_v24, %v815_v16  ;;  %v633_v28 = vsel %vm632_vm4, %v629_v15, %v631_v23  ;;  %vm1960_vm4 = vcmp.eq.s32.totalorder %v825_v35, 1 }
  0x89   : > { %v647_v29 = vsel %vm1894_vm6, %v633_v28, 0.0  ;;  %v646_v30 = vsel %vm1898_vm7, %v634_v25, 0.0  ;;  %v833_v36 = vsel %vm1908_vm11, %v820_v27, 0.0  ;;  %v819_v49 = vsel %vm818_vm5, %v815_v16, %v817_v24  ;;  %vm530_vm7 = vmand %vm321_vm2, %vm529_vm1 }
  0x8a   : > { %1660 = vmatprep.subr.msk.mxu0 %vm364_vm9, %v647_v29  ;;  %vm1967_vm6 = vcmp.eq.s32.totalorder %v935_v42, 1  ;;  %vm318_vm5 = vcmp.lt.s32.totalorder %v1880_v11, 17  ;;  %v832_v56 = vsel %vm1960_vm4, %v819_v49, 0.0  ;;  %vm1992_vm2 = vcmp.eq.s32.totalorder %v332_v47, 1 }
  0x8b   : > { %1661 = vmatpush1.msk.msra.mxu0 %vm364_vm9, %v646_v30  ;;  %v341_v37 = vpop.permute.xlu1 %340  ;;  %v339_v38 = vpop.permute.xlu0 %338  ;;  %v531_v63 = vsel %vm530_vm7, 1, %v1765_v0  ;;  %vm1028_vm11 = vcmp.lt.s32.totalorder %v1880_v11, 112  ;;  %vm526_vm1 = vcmp.lt.s32.totalorder %v1880_v11, 15  ;;  %vm1040_vm4 = vcmp.eq.s32.totalorder %v1035_v26, 1 }
  0x8c   : > { %1662 = vmatmul.mubr.msk.f32.vlgmr.msra.gmra.mrb[0].mxu0 %vm360_vm10, %v1659_v31  ;;  %v344_v40 = vsel %vm342_vm13, %v341_v37, %v339_v38  ;;  %1664 = vmatprep.subr.msk.mxu0 %vm364_vm9, %v1844_v3  ;;  %v343_v41 = vsel %vm342_vm13, %v339_v38, %v341_v37  ;;  %v535_v15 = vrot.slane %v531_v63, %v1871_v8  ;;  %vm2020_vm13 = vcmp.eq.s32.totalorder %v931_v59, 1  ;;  %v1671_v38 = vld [vmem:[%s2162_s3 + $0x18] sm:$0xf] }
  0x8d   : > { %v357_v43 = vsel %vm1928_vm14, %v343_v41, 0.0  ;;  %1665 = vmatpush1.msk.msra.mxu0 %vm364_vm9, %v1838_v2  ;;  %v356_v44 = vsel %vm1932_vm15, %v344_v40, 0.0  ;;  %805 = vmatprep.mubr.f32.mxu0 %v1766_v1  ;;  %v539_v16 = vrot.slane %v531_v63, %v1873_v9  ;;  %vm2027_vm14 = vcmp.eq.s32.totalorder %v1039_v10, 1 }
  0x8e   : > { %1649 = vmatprep.subr.msk.mxu1 %vm364_vm9, %v357_v43  ;;  %1668 = vmatprep.subr.msk.mxu0 %vm364_vm9, %v833_v36  ;;  %vm2042_vm3 = vcmp.eq.s32.totalorder %v535_v15, 1  ;;  %v1144_v31 = vrot.slane %v1136_v22, %v1873_v9  ;;  %v1140_v40 = vrot.slane %v1136_v22, %v1871_v8  ;;  %v1675_v43 = vld [vmem:[%s2162_s3 + $0x1c] sm:$0xf]  ;;  %v1679_v8 = vld [vmem:[%s2162_s3 + $0x20] sm:$0xf] }
  0x8f   : > { %v921_v50 = vpop.permute.xlu1 %920  ;;  %1650 = vmatpush1.msk.msra.mxu1 %vm364_vm9, %v356_v44  ;;  %v919_v51 = vpop.permute.xlu0 %918  ;;  %vm2046_vm15 = vcmp.eq.s32.totalorder %v539_v16, 1 }
  0x90   : > { %v924_v53 = vsel %vm922_vm0, %v921_v50, %v919_v51  ;;  %1651 = vmatmul.mubr.msk.f32.vlgmr.msra.gmra.mrb[0].mxu1 %vm360_vm10, %v1648_v45  ;;  %v923_v18 = vsel %vm922_vm0, %v919_v51, %v921_v50  ;;  %vm1132_vm0 = vcmp.lt.s32.totalorder %v1880_v11, 111  ;;  %vm1145_vm7 = vcmp.eq.s32.totalorder %v1140_v40, 1  ;;  %v1291_v11 = vld [vmem:[%s2164_s5] sm:$0xff]  ;;  %v1292_v45 = vld [vmem:[%s2164_s5 + $0x8] sm:$0xff] }
  0x91   : > { %515 = vmatprep.mubr.f32.mxu1 %v1766_v1  ;;  %v939_v60 = vsel %vm1967_vm6, %v924_v53, 0.0  ;;  %v938_v23 = vsel %vm2020_vm13, %v923_v18, 0.0  ;;  %vm1146_vm6 = vcmp.eq.s32.totalorder %v1144_v31, 1  ;;  %1295 = vperm.xlu0 %1730, %v1291_v11   ;;  %v1289_v11 = vld [vmem:[%s2163_s4] sm:$0xff] }
  0x92   : > { %1300 = vperm.xlu1 %1731, %v1292_v45   ;;  %v1290_v45 = vld [vmem:[%s2163_s4 + $0x8] sm:$0xff] }
  0x93   : > { %v315_v61 = vpop.permute.xlu1 %314  ;;  %v313_v62 = vpop.permute.xlu0 %312 }
  0x94   : > { %1666 = vmatmul.mubr.msk.f32.vlgmr.msra.gmra.mrb[0].mxu0 %vm360_vm10, %v1663_v54  ;;  %v319_v4 = vsel %vm318_vm5, %v313_v62, %v315_v61  ;;  %v320_v6 = vsel %vm318_vm5, %v315_v61, %v313_v62 }
  0x95   : > { %1669 = vmatpush1.msk.msra.mxu0 %vm364_vm9, %v832_v56  ;;  %v335_v12 = vsel %vm1988_vm8, %v320_v6, 0.0  ;;  %v336_v13 = vsel %vm1992_vm2, %v319_v4, 0.0  ;;  %909 = vmatprep.mubr.f32.mxu0 %v1766_v1 }
  0x96   : > { %1652 = vmatprep.subr.msk.mxu1 %vm364_vm9, %v336_v13  ;;  %1672 = vmatprep.subr.msk.mxu0 %vm364_vm9, %v939_v60 }
  0x97   : > { %v1027_v19 = vpop.permute.xlu1 %1026  ;;  %1653 = vmatpush1.msk.msra.mxu1 %vm364_vm9, %v335_v12  ;;  %v1025_v20 = vpop.permute.xlu0 %1024  ;;  %1504 = vperm.xlu1 %1731, %v1501_v46  }
  0x98   : > { %v1030_v5 = vsel %vm1028_vm11, %v1027_v19, %v1025_v20  ;;  %1654 = vmatmul.mubr.msk.f32.vlgmr.msra.gmra.mrb[0].mxu1 %vm360_vm10, %v337_v14  ;;  %v1029_v9 = vsel %vm1028_vm11, %v1025_v20, %v1027_v19 }
  0x99   : > { %619 = vmatprep.mubr.f32.mxu1 %v1766_v1  ;;  %v1043_v27 = vsel %vm2027_vm14, %v1030_v5, 0.0  ;;  %v1042_v39 = vsel %vm1040_vm4, %v1029_v9, 0.0 }
  0x9b   : > { %v525_v28 = vpop.permute.xlu1 %524  ;;  %v523_v29 = vpop.permute.xlu0 %522 }
  0x9c   : > { %1670 = vmatmul.mubr.msk.f32.vlgmr.msra.gmra.mrb[0].mxu0 %vm360_vm10, %v1667_v7  ;;  %v527_v0 = vsel %vm526_vm1, %v523_v29, %v525_v28  ;;  %v528_v30 = vsel %vm526_vm1, %v525_v28, %v523_v29 }
  0x9d   : > { %v542_v32 = vsel %vm2042_vm3, %v528_v30, 0.0  ;;  %v543_v33 = vsel %vm2046_vm15, %v527_v0, 0.0  ;;  %1673 = vmatpush1.msk.msra.mxu0 %vm364_vm9, %v938_v23  ;;  %1015 = vmatprep.mubr.f32.mxu0 %v1766_v1 }
  0x9e   : > { %1656 = vmatprep.subr.msk.mxu1 %vm364_vm9, %v543_v33  ;;  %1676 = vmatprep.subr.msk.mxu0 %vm364_vm9, %v1043_v27 }
  0x9f   : > { %1657 = vmatpush1.msk.msra.mxu1 %vm364_vm9, %v542_v32  ;;  %v1131_v35 = vpop.permute.xlu1 %1130  ;;  %v1129_v36 = vpop.permute.xlu0 %1128 }
  0xa0   : > { %1658 = vmatmul.mubr.msk.f32.vlgmr.msra.gmra.mrb[0].mxu1 %vm360_vm10, %v1655_v34  ;;  %v1134_v37 = vsel %vm1132_vm0, %v1131_v35, %v1129_v36  ;;  %v1133_v42 = vsel %vm1132_vm0, %v1129_v36, %v1131_v35 }
  0xa1   : > { %1379 = vmatprep.mubr.f32.mxu1 %v1766_v1  ;;  %v1148_v41 = vsel %vm1146_vm6, %v1134_v37, 0.0  ;;  %v1147_v44 = vsel %vm1145_vm7, %v1133_v42, 0.0 }
  0xa4   : > { %1674 = vmatmul.mubr.msk.f32.vlgmr.msra.gmra.mrb[0].mxu0 %vm360_vm10, %v1671_v38 }
  0xa5   : > { %1677 = vmatpush1.msk.msra.mxu0 %vm364_vm9, %v1042_v39  ;;  %1119 = vmatprep.mubr.f32.mxu0 %v1766_v1 }
  0xa6   : > { %1680 = vmatprep.subr.msk.mxu0 %vm364_vm9, %v1148_v41 }
  0xac   : > { %1678 = vmatmul.mubr.msk.f32.vlgmr.msra.gmra.mrb[0].mxu0 %vm360_vm10, %v1675_v43 }
  0xad   : > { %1681 = vmatpush1.msk.msra.mxu0 %vm364_vm9, %v1147_v44  ;;  %1224 = vmatprep.mubr.f32.mxu0 %v1766_v1 }
  0xb4   : > { %1682 = vmatmul.mubr.msk.f32.vlgmr.msra.gmra.mrb[0].mxu0 %vm360_vm10, %v1679_v8 }
 0x173   : > { %v621_v47 = vpop.f32.mrb[0].mxu1 }
 0x174   : > { %v623_v48 = vpop.f32.mrb[1].mxu1 }
 0x187   : > { %v1226_v49 = vpop.f32.mrb[0].mxu0 }
 0x188   : > { %v1696_v50 = vadd.f32 %v1226_v49, %v621_v47  ;;  %v1228_v51 = vpop.f32.mrb[1].mxu0 }
 0x189   : > { %v1697_v52 = vadd.f32 %v1228_v51, %v623_v48 }
 0x18a   : > { %v1235_v53 = vmul.f32 0.70710677, %v1696_v50  ;;  %v1233_v37 = vmul.f32 0.5, %v1696_v50  ;;  %v1301_v50 = vpop.permute.xlu1 %1300 }
 0x18b   : > { %v1236_v54 = vmul.f32 0.70710677, %v1697_v52  ;;  %v1234_v40 = vmul.f32 0.5, %v1697_v52 }
 0x18c   : > { %v1237_v55 = vand.u32 2147483647, %v1235_v53  ;;  %vm1277_vm5 = vcmp.lt.f32.partialorder %v1235_v53, 0.0 }
 0x18d   : > { %v1238_v56 = vand.u32 2147483647, %v1236_v54  ;;  %vm1278_vm8 = vcmp.lt.f32.partialorder %v1236_v54, 0.0 }
 0x18e   : > { %v1239_v57 = vmul.f32 0.3275911, %v1237_v55  ;;  %v1265_v61 = vmul.f32 %v1237_v55, %v1237_v55 }
 0x18f   : > { %v1240_v58 = vmul.f32 0.3275911, %v1238_v56  ;;  %v1266_v62 = vmul.f32 %v1238_v56, %v1238_v56 }
 0x190   : > { %v1241_v59 = vadd.f32 1.0, %v1239_v57  ;;  %v1267_v4 = vsub.f32 0.0, %v1265_v61 }
 0x191   : > { %v1242_v60 = vadd.f32 1.0, %v1240_v58  ;;  %v1268_v12 = vsub.f32 0.0, %v1266_v62 }
 0x192   : > { %1733 = vrcp.f32 %v1241_v59  ;;  %v1269_v15 = vmul.f32 1.442695, %v1267_v4 }
 0x193   : > { %1735 = vrcp.f32 %v1242_v60  ;;  %v1271_v18 = vmul.f32 1.442695, %v1268_v12 }
 0x194   : > { %1737 = vpow2.f32 %v1269_v15 }
 0x195   : > { %1739 = vpow2.f32 %v1271_v18 }
 0x19c   : > { %v1734_v63 = vpop.eup %1733 }
 0x19d   : > { %v1736_v6 = vpop.eup %1735  ;;  %v1247_v10 = vmul.f32 1.0614054, %v1734_v63 }
 0x19e   : > { %v1248_v13 = vmul.f32 1.0614054, %v1736_v6  ;;  %v1738_v29 = vpop.eup %1737 }
 0x19f   : > { %v1249_v14 = vadd.f32 -1.4531521, %v1247_v10  ;;  %v1740_v30 = vpop.eup %1739 }
 0x1a0   : > { %v1250_v16 = vadd.f32 -1.4531521, %v1248_v13 }
 0x1a1   : > { %v1251_v17 = vmul.f32 %v1734_v63, %v1249_v14 }
 0x1a2   : > { %v1252_v19 = vmul.f32 %v1736_v6, %v1250_v16 }
 0x1a3   : > { %v1253_v20 = vadd.f32 1.4214138, %v1251_v17 }
 0x1a4   : > { %v1254_v21 = vadd.f32 1.4214138, %v1252_v19 }
 0x1a5   : > { %v1255_v5 = vmul.f32 %v1734_v63, %v1253_v20 }
 0x1a6   : > { %v1256_v7 = vmul.f32 %v1736_v6, %v1254_v21 }
 0x1a7   : > { %v1257_v22 = vadd.f32 -0.28449672, %v1255_v5 }
 0x1a8   : > { %v1258_v23 = vadd.f32 -0.28449672, %v1256_v7 }
 0x1a9   : > { %v1259_v24 = vmul.f32 %v1734_v63, %v1257_v22 }
 0x1aa   : > { %v1260_v25 = vmul.f32 %v1736_v6, %v1258_v23 }
 0x1ab   : > { %v1261_v26 = vadd.f32 0.2548296, %v1259_v24 }
 0x1ac   : > { %v1262_v27 = vadd.f32 0.2548296, %v1260_v25 }
 0x1ad   : > { %v1263_v28 = vmul.f32 %v1734_v63, %v1261_v26 }
 0x1ae   : > { %v1264_v0 = vmul.f32 %v1736_v6, %v1262_v27 }
 0x1af   : > { %v1273_v31 = vmul.f32 %v1738_v29, %v1263_v28 }
 0x1b0   : > { %v1274_v32 = vmul.f32 %v1740_v30, %v1264_v0 }
 0x1b1   : > { %v1275_v33 = vsub.f32 1.0, %v1273_v31 }
 0x1b2   : > { %v1276_v34 = vsub.f32 1.0, %v1274_v32 }
 0x1b3   : > { %v1279_v9 = vsub.f32 0.0, %v1275_v33 }
 0x1b4   : > { %v1280_v35 = vsub.f32 0.0, %v1276_v34 }
 0x1b5   : > { %v1281_v36 = vsel %vm1277_vm5, %v1279_v9, %v1275_v33 }
 0x1b6   : > { %v1283_v38 = vadd.f32 1.0, %v1281_v36  ;;  %v1282_v39 = vsel %vm1278_vm8, %v1280_v35, %v1276_v34 }
 0x1b7   : > { %v1284_v41 = vadd.f32 1.0, %v1282_v39 }
 0x1b8   : > { %v1285_v42 = vmul.f32 %v1283_v38, %v1233_v37 }
 0x1b9   : > { %v1286_v43 = vmul.f32 %v1284_v41, %v1234_v40 }
 0x1ba   : > { %v1287_v8 = vadd.f32 %v1285_v42, %v1838_v2  ;;  %v1296_v2 = vpop.permute.xlu0 %1295 }
 0x1bb   : > { %v1288_v44 = vadd.f32 %v1286_v43, %v1844_v3 }
 0x1bd   : > { %1683 = vmatprep.subr.msk.mxu1 %vm364_vm9, %v1288_v44 }
 0x1be   : > { %1684 = vmatpush1.msk.msra.mxu1 %vm364_vm9, %v1287_v8 }
 0x1bf   : > { %1685 = vmatmul.mubr.msk.f32.vlgmr.msra.gmra.mrb[2].mxu1 %vm360_vm10, %v1289_v11 }
 0x1c0   : > { %1385 = vmatprep.mubr.f32.mxu1 %v1766_v1 }
 0x1c3   : > { %1686 = vmatmul.mubr.msk.f32.gmra.mrb[4].mxu1 %vm360_vm10, %v1290_v45 }
 0x1c4   : > { %1575 = vmatprep.mubr.f32.mxu1 %v1766_v1 }
 0x292   : > { %v1381_v3 = vpop.f32.mrb[2].mxu1 }
 0x293   : > { %v2117_v46 = vadd.f32 %v1381_v3, %v1296_v2  ;;  %v1383_v47 = vpop.f32.mrb[3].mxu1 }
 0x294   : > { %v2119_v48 = vadd.f32 %v1383_v47, %v1296_v2 }
 0x295   : > { %v2122_v49 = vmul.f32 0.70710677, %v2117_v46 }
 0x296   : > { %v2125_v51 = vmul.f32 0.70710677, %v2119_v48  ;;  %v1387_v52 = vpop.f32.mrb[4].mxu1 }
 0x297   : > { %v1400_v53 = vand.u32 2147483647, %v2122_v49  ;;  %v2128_v54 = vadd.f32 %v1387_v52, %v1301_v50  ;;  %v1389_v1 = vpop.f32.mrb[5].mxu1  ;;  %vm1480_vm9 = vcmp.lt.f32.partialorder %v2122_v49, 0.0 }
 0x298   : > { %v1401_v55 = vand.u32 2147483647, %v2125_v51  ;;  %v2131_v56 = vadd.f32 %v1389_v1, %v1301_v50  ;;  %vm1481_vm10 = vcmp.lt.f32.partialorder %v2125_v51, 0.0  ;;  %v1393_v51 = vmul.f32 0.5, %v2119_v48 }
 0x299   : > { %v1404_v57 = vmul.f32 0.3275911, %v1400_v53  ;;  %v2134_v58 = vmul.f32 0.70710677, %v2128_v54  ;;  %v1456_v14 = vmul.f32 %v1400_v53, %v1400_v53  ;;  %v1394_v49 = vmul.f32 0.5, %v2128_v54  ;;  %v1505_v54 = vpop.permute.xlu1 %1504 }
 0x29a   : > { %v1405_v59 = vmul.f32 0.3275911, %v1401_v55  ;;  %v2137_v60 = vmul.f32 0.70710677, %v2131_v56  ;;  %v1457_v15 = vmul.f32 %v1401_v55, %v1401_v55 }
 0x29b   : > { %v1408_v61 = vadd.f32 1.0, %v1404_v57  ;;  %v1402_v62 = vand.u32 2147483647, %v2134_v58  ;;  %v1460_v17 = vsub.f32 0.0, %v1456_v14  ;;  %vm1482_vm2 = vcmp.lt.f32.partialorder %v2134_v58, 0.0 }
 0x29c   : > { %v1409_v63 = vadd.f32 1.0, %v1405_v59  ;;  %v1403_v4 = vand.u32 2147483647, %v2137_v60  ;;  %v1461_v21 = vsub.f32 0.0, %v1457_v15  ;;  %vm1483_vm11 = vcmp.lt.f32.partialorder %v2137_v60, 0.0 }
 0x29d   : > { %1741 = vrcp.f32 %v1408_v61  ;;  %v1406_v6 = vmul.f32 0.3275911, %v1402_v62  ;;  %v1458_v18 = vmul.f32 %v1402_v62, %v1402_v62  ;;  %v1464_v24 = vmul.f32 1.442695, %v1460_v17 }
 0x29e   : > { %1743 = vrcp.f32 %v1409_v63  ;;  %v1407_v10 = vmul.f32 0.3275911, %v1403_v4  ;;  %v1459_v5 = vmul.f32 %v1403_v4, %v1403_v4  ;;  %v1466_v29 = vmul.f32 1.442695, %v1461_v21 }
 0x29f   : > { %v1410_v12 = vadd.f32 1.0, %v1406_v6  ;;  %v1462_v26 = vsub.f32 0.0, %v1458_v18 }
 0x2a0   : > { %v1411_v13 = vadd.f32 1.0, %v1407_v10  ;;  %v1463_v30 = vsub.f32 0.0, %v1459_v5 }
 0x2a1   : > { %1745 = vrcp.f32 %v1410_v12  ;;  %v1468_v35 = vmul.f32 1.442695, %v1462_v26 }
 0x2a2   : > { %1747 = vrcp.f32 %v1411_v13  ;;  %v1470_v39 = vmul.f32 1.442695, %v1463_v30 }
 0x2a3   : > { %1749 = vpow2.f32 %v1464_v24 }
 0x2a4   : > { %1751 = vpow2.f32 %v1466_v29  ;;  %v1392_v29 = vmul.f32 0.5, %v2117_v46  ;;  %v1500_v46 = vld [vmem:[%s2165_s6] sm:$0xff] }
 0x2a5   : > { %1753 = vpow2.f32 %v1468_v35 }
 0x2a6   : > { %1755 = vpow2.f32 %v1470_v39 }
 0x2a7   : > { %v1742_v16 = vpop.eup %1741 }
 0x2a8   : > { %v1744_v19 = vpop.eup %1743  ;;  %v1420_v20 = vmul.f32 1.0614054, %v1742_v16 }
 0x2a9   : > { %v1421_v7 = vmul.f32 1.0614054, %v1744_v19 }
 0x2aa   : > { %v1424_v22 = vadd.f32 -1.4531521, %v1420_v20 }
 0x2ab   : > { %v1746_v23 = vpop.eup %1745  ;;  %v1425_v25 = vadd.f32 -1.4531521, %v1421_v7 }
 0x2ac   : > { %v1748_v27 = vpop.eup %1747  ;;  %v1428_v28 = vmul.f32 %v1742_v16, %v1424_v22  ;;  %v1422_v0 = vmul.f32 1.0614054, %v1746_v23 }
 0x2ad   : > { %v1429_v31 = vmul.f32 %v1744_v19, %v1425_v25  ;;  %v1423_v32 = vmul.f32 1.0614054, %v1748_v27  ;;  %v1750_v57 = vpop.eup %1749 }
 0x2ae   : > { %v1432_v33 = vadd.f32 1.4214138, %v1428_v28  ;;  %v1426_v34 = vadd.f32 -1.4531521, %v1422_v0  ;;  %v1752_v62 = vpop.eup %1751 }
 0x2af   : > { %v1433_v9 = vadd.f32 1.4214138, %v1429_v31  ;;  %v1427_v36 = vadd.f32 -1.4531521, %v1423_v32  ;;  %v1754_v14 = vpop.eup %1753  ;;  %v1395_v31 = vmul.f32 0.5, %v2131_v56 }
 0x2b0   : > { %v1436_v37 = vmul.f32 %v1742_v16, %v1432_v33  ;;  %v1430_v38 = vmul.f32 %v1746_v23, %v1426_v34  ;;  %v1756_v18 = vpop.eup %1755 }
 0x2b1   : > { %v1437_v40 = vmul.f32 %v1744_v19, %v1433_v9  ;;  %v1431_v41 = vmul.f32 %v1748_v27, %v1427_v36 }
 0x2b2   : > { %v1440_v42 = vadd.f32 -0.28449672, %v1436_v37  ;;  %v1434_v43 = vadd.f32 1.4214138, %v1430_v38 }
 0x2b3   : > { %v1441_v44 = vadd.f32 -0.28449672, %v1437_v40  ;;  %v1435_v8 = vadd.f32 1.4214138, %v1431_v41 }
 0x2b4   : > { %v1444_v11 = vmul.f32 %v1742_v16, %v1440_v42  ;;  %v1438_v45 = vmul.f32 %v1746_v23, %v1434_v43 }
 0x2b5   : > { %v1445_v2 = vmul.f32 %v1744_v19, %v1441_v44  ;;  %v1439_v3 = vmul.f32 %v1748_v27, %v1435_v8 }
 0x2b6   : > { %v1448_v47 = vadd.f32 0.2548296, %v1444_v11  ;;  %v1442_v50 = vadd.f32 -0.28449672, %v1438_v45 }
 0x2b7   : > { %v1449_v52 = vadd.f32 0.2548296, %v1445_v2  ;;  %v1443_v53 = vadd.f32 -0.28449672, %v1439_v3 }
 0x2b8   : > { %v1452_v1 = vmul.f32 %v1742_v16, %v1448_v47  ;;  %v1446_v55 = vmul.f32 %v1746_v23, %v1442_v50 }
 0x2b9   : > { %v1453_v59 = vmul.f32 %v1744_v19, %v1449_v52  ;;  %v1447_v61 = vmul.f32 %v1748_v27, %v1443_v53 }
 0x2ba   : > { %v1472_v63 = vmul.f32 %v1750_v57, %v1452_v1  ;;  %v1450_v4 = vadd.f32 0.2548296, %v1446_v55 }
 0x2bb   : > { %v1473_v6 = vmul.f32 %v1752_v62, %v1453_v59  ;;  %v1451_v10 = vadd.f32 0.2548296, %v1447_v61 }
 0x2bc   : > { %v1476_v12 = vsub.f32 1.0, %v1472_v63  ;;  %v1454_v13 = vmul.f32 %v1746_v23, %v1450_v4 }
 0x2bd   : > { %v1477_v15 = vsub.f32 1.0, %v1473_v6  ;;  %v1455_v17 = vmul.f32 %v1748_v27, %v1451_v10 }
 0x2be   : > { %v1484_v20 = vsub.f32 0.0, %v1476_v12  ;;  %v1474_v21 = vmul.f32 %v1754_v14, %v1454_v13 }
 0x2bf   : > { %v1485_v16 = vsub.f32 0.0, %v1477_v15  ;;  %v1475_v5 = vmul.f32 %v1756_v18, %v1455_v17 }
 0x2c0   : > { %v1488_v7 = vsel %vm1480_vm9, %v1484_v20, %v1476_v12  ;;  %v1478_v19 = vsub.f32 1.0, %v1474_v21 }
 0x2c1   : > { %v1489_v22 = vsel %vm1481_vm10, %v1485_v16, %v1477_v15  ;;  %v1479_v24 = vsub.f32 1.0, %v1475_v5  ;;  %v1492_v26 = vadd.f32 1.0, %v1488_v7 }
 0x2c2   : > { %v1486_v25 = vsub.f32 0.0, %v1478_v19  ;;  %v1493_v28 = vadd.f32 1.0, %v1489_v22 }
 0x2c3   : > { %v1487_v23 = vsub.f32 0.0, %v1479_v24  ;;  %v1496_v33 = vmul.f32 %v1492_v26, %v1392_v29 }
 0x2c4   : > { %v1490_v27 = vsel %vm1482_vm2, %v1486_v25, %v1478_v19  ;;  %v1497_v58 = vmul.f32 %v1493_v28, %v1393_v51 }
 0x2c5   : > { %v1494_v0 = vadd.f32 1.0, %v1490_v27  ;;  %v1491_v30 = vsel %vm1483_vm11, %v1487_v23, %v1479_v24 }
 0x2c6   : > { %v1495_v32 = vadd.f32 1.0, %v1491_v30 }
 0x2c7   : > { %v1498_v34 = vmul.f32 %v1494_v0, %v1394_v49 }
 0x2c8   : > { %v1499_v9 = vmul.f32 %v1495_v32, %v1395_v31 }
 0x2c9   : > { %v1694_v35 = vpack.c.bf16 %v1498_v34, %v1496_v33 }
 0x2ca   : > { %v1692_v36 = vpack.c.bf16 %v1499_v9, %v1497_v58 }
 0x2cc   : > { %1693 = vmatprep.subr.bf16.mxu1 %v1692_v36 }
 0x2cd   : > { %1695 = vmatpush1.bf16.msra.mxu1 %v1694_v35 }
 0x2d0   : > { %1687 = vmatmul.mubr.msk.f32.vlgmr.msra.gmra.mrb[6].mxu1 %vm1507_vm12, %v1500_v46 }
 0x3a3   : > { %v1577_v48 = vpop.f32.mrb[6].mxu1 }
 0x3a4   : > { %v1578_v56 = vadd.f32 %v1577_v48, %v1505_v54  ;;  %v1579_v60 = vpop.f32.mrb[7].mxu1 }
 0x3a5   : > { %v1580_v37 = vadd.f32 %v1579_v60, %v1505_v54 }
 0x3a6   : > { %1582 = vst [vmem:[%s305_s16] sm:$0xff] %v1578_v56 }
 0x3a7   : > { %1583 = vst [vmem:[%s305_s16 + $0x8] sm:$0xff] %v1580_v37 }
 0x3a8 PF: > { %s18_s27 = sadd.s32 1, %s1763_s27  }
 0x3a9   : > { %p15_p4 = scmp.ge.s32.totalorder %s18_s27, 4  }
 0x3ab   :  { %17 = sbr.rel (!%p15_p4) target bundleno = 1 (0x1), region = 90 }

</bundles_post_ra>
